<compile_context>
chip_gen: v5e
topology: v5e:2x2
jax: 0.10.0
libtpu: 0.0.40
codegen_flags: <defaults>
</compile_context>

<pallas_src>
import jax
import jax.numpy as jnp
from jax.experimental import pallas as pl
from jax.experimental.pallas import tpu as pltpu

EPS = 1e-5
C_IN = 32


# ----------------------------- Pallas kernels ------------------------------

def _stats_kernel(x_ref, sum_ref, gram_ref):
    """Accumulate per-channel sum (32,1) and Gram matrix (32,32) over tiles."""
    @pl.when(jnp.logical_and(pl.program_id(0) == 0, pl.program_id(1) == 0))
    def _():
        sum_ref[...] = jnp.zeros_like(sum_ref)
        gram_ref[...] = jnp.zeros_like(gram_ref)

    x = x_ref[0]                                            # (32, T)
    sum_ref[...] += jnp.sum(x, axis=1, keepdims=True)       # (32, 1)
    gram_ref[...] += jax.lax.dot_general(                   # x @ x^T -> (32, 32)
        x, x, (((1,), (1,)), ((), ())), preferred_element_type=jnp.float32)


def _apply_kernel(x_ref, w_ref, b_ref, o_ref):
    """out = sigmoid(w_eff . x + b_eff) for one (32, T) pixel tile."""
    x = x_ref[0]                                            # (32, T)
    w = w_ref[...]                                          # (32, 1)
    logits = jnp.sum(x * w, axis=0, keepdims=True)          # (1, T) lane-dense
    o_ref[0] = jax.nn.sigmoid(logits + b_ref[...])


# ------------------------------- host glue ---------------------------------

def _pick_tile(hw):
    """Largest 128-multiple divisor of HW up to 4096 (else full extent)."""
    if hw % 128 != 0:
        return hw
    for t in (4096, 2048, 1024, 512, 256, 128):
        if hw % t == 0:
            return t
    return hw


def _fold_params(sum_x, gram, count, params):
    """Exact training-mode BN fold: collapse conv1/bn1/.../clshead into one
    effective (32, 1) weight and a scalar bias, using only mean(x) and
    E[x x^T] (everything between BNs is affine in x)."""
    (w1, g1, b1, w2, g2, b2, w3, g3, b3, wc, bc) = params
    mean_x = (sum_x / count).reshape(C_IN)                  # (32,)
    cov = gram / count - jnp.outer(mean_x, mean_x)          # biased covariance

    def fold_bn(a_pre, c_pre, g, b):
        # Pre-BN layer output is y = x @ a_pre + c_pre  (a_pre: (32, Cout)).
        m = mean_x @ a_pre + c_pre                          # per-channel mean
        v = jnp.einsum("kj,kl,lj->j", a_pre, cov, a_pre)    # per-channel var
        s = g / jnp.sqrt(v + EPS)
        return a_pre * s, (c_pre - m) * s + b

    g1, b1, g2, b2, g3, b3 = (p.reshape(-1) for p in (g1, b1, g2, b2, g3, b3))
    a1, c1 = fold_bn(w1, jnp.zeros((16,), jnp.float32), g1, b1)
    a2, c2 = fold_bn(a1 @ w2, c1 @ w2, g2, b2)
    a3, c3 = fold_bn(a2 @ w3, c2 @ w3, g3, b3)
    w_eff = a3 @ wc                                         # (32, 1)
    b_eff = (c3 @ wc).reshape(1, 1) + bc                    # (1, 1)
    return w_eff, b_eff


def detection_header(x_nchw, params):
    """x_nchw: (N, 32, H, W) float32.  Returns (N, 1, H, W) float32."""
    N, C, H, W = x_nchw.shape
    assert C == C_IN, "Detection_Header expects 32 input channels"
    HW = H * W
    x3 = x_nchw.reshape(N, C, HW)        # free reshape, channels on sublanes
    T = _pick_tile(HW)
    nT = HW // T

    # Pass 1: global BN moments (reduction over batch + pixel tiles).
    sum_x, gram = pl.pallas_call(
        _stats_kernel,
        out_shape=(jax.ShapeDtypeStruct((C, 1), jnp.float32),
                   jax.ShapeDtypeStruct((C, C), jnp.float32)),
        grid=(N, nT),
        in_specs=[pl.BlockSpec((1, C, T), lambda n, t: (n, 0, t))],
        out_specs=(pl.BlockSpec((C, 1), lambda n, t: (0, 0)),
                   pl.BlockSpec((C, C), lambda n, t: (0, 0))),
        compiler_params=pltpu.CompilerParams(
            dimension_semantics=("arbitrary", "arbitrary")),
    )(x3)

    # Tiny 32x32 parameter-folding math (plain JAX glue).
    w_eff, b_eff = _fold_params(sum_x, gram, N * HW, params)

    # Pass 2: fused matvec + sigmoid, embarrassingly parallel, pipelined.
    out3 = pl.pallas_call(
        _apply_kernel,
        out_shape=jax.ShapeDtypeStruct((N, 1, HW), jnp.float32),
        grid=(N, nT),
        in_specs=[pl.BlockSpec((1, C, T), lambda n, t: (n, 0, t)),
                  pl.BlockSpec((C, 1), lambda n, t: (0, 0)),
                  pl.BlockSpec((1, 1), lambda n, t: (0, 0))],
        out_specs=pl.BlockSpec((1, 1, T), lambda n, t: (n, 0, t)),
        compiler_params=pltpu.CompilerParams(
            dimension_semantics=("parallel", "parallel")),
    )(x3, w_eff, b_eff)

    return out3.reshape(N, 1, H, W)


# ----------------------------- params / reference ---------------------------

def init_params(key):
    ks = jax.random.split(key, 5)
    scale = 0.1
    w1 = scale * jax.random.normal(ks[0], (32, 16), jnp.float32)
    w2 = scale * jax.random.normal(ks[1], (16, 16), jnp.float32)
    w3 = scale * jax.random.normal(ks[2], (16, 16), jnp.float32)
    wc = scale * jax.random.normal(ks[3], (16, 1), jnp.float32)
    bc = scale * jax.random.normal(ks[4], (1, 1), jnp.float32)
    g1 = jnp.full((1, 16), 1.1, jnp.float32);  b1 = jnp.full((1, 16), 0.05, jnp.float32)
    g2 = jnp.full((1, 16), 0.9, jnp.float32);  b2 = jnp.full((1, 16), -0.02, jnp.float32)
    g3 = jnp.full((1, 16), 1.05, jnp.float32); b3 = jnp.full((1, 16), 0.01, jnp.float32)
    return (w1, g1, b1, w2, g2, b2, w3, g3, b3, wc, bc)


def reference_forward(x_nchw, params):
    """Pure-JAX reference mirroring PyTorch training-mode forward."""
    (w1, g1, b1, w2, g2, b2, w3, g3, b3, wc, bc) = params
    N, C, H, W = x_nchw.shape
    x = jnp.transpose(x_nchw, (0, 2, 3, 1)).reshape(N * H * W, C)

    def bn(y, g, b):
        m = jnp.mean(y, axis=0, keepdims=True)
        v = jnp.mean((y - m) ** 2, axis=0, keepdims=True)
        return (y - m) / jnp.sqrt(v + EPS) * g + b

    y = bn(x @ w1, g1, b1)
    y = bn(y @ w2, g2, b2)
    y = bn(y @ w3, g3, b3)
    out = jax.nn.sigmoid(y @ wc + bc)
    return jnp.transpose(out.reshape(N, H, W, 1), (0, 3, 1, 2))


if __name__ == "__main__":
    key = jax.random.PRNGKey(0)
    k_x, k_p = jax.random.split(key)

    N, C, H, W = 2, 32, 16, 16   # conv1 requires 32 input channels
    x = jax.random.normal(k_x, (N, C, H, W), jnp.float32)
    params = init_params(k_p)

    fwd = jax.jit(detection_header)
    out = jax.block_until_ready(fwd(x, params))

    ref = reference_forward(x, params)
    assert out.shape == (N, 1, H, W)
    assert jnp.allclose(out, ref, atol=1e-4, rtol=1e-4), "mismatch vs JAX reference"

    print("KERNEL_OK")
</pallas_src>

<mosaic_0001>
module attributes {stable_mosaic.version = 11 : i64} {
  func.func @_stats_kernel(%arg0: i32, %arg1: i32, %arg2: memref<1x32x256xf32, #tpu.memory_space<vmem>>, %arg3: memref<32x1xf32, #tpu.memory_space<vmem>>, %arg4: memref<32x32xf32, #tpu.memory_space<vmem>>) attributes {dimension_semantics = [#tpu.dimension_semantics<arbitrary>, #tpu.dimension_semantics<arbitrary>], iteration_bounds = array<i64: 2, 1>, scalar_prefetch = 0 : i64, scratch_operands = 0 : i64, tpu.core_type = #tpu.core_type<tc>, window_params = [{transform_indices = @transform_0, window_bounds = array<i64: 1, 32, 256>}, {pipeline_mode = #tpu.pipeline_mode<synchronous>, transform_indices = @transform_1, window_bounds = array<i64: 32, 1>}, {pipeline_mode = #tpu.pipeline_mode<synchronous>, transform_indices = @transform_2, window_bounds = array<i64: 32, 32>}]} {
    %c0_i32 = arith.constant 0 : i32
    %0 = arith.cmpi eq, %arg0, %c0_i32 : i32
    %c0_i32_0 = arith.constant 0 : i32
    %1 = arith.cmpi eq, %arg1, %c0_i32_0 : i32
    %2 = arith.andi %0, %1 : i1
    %3 = arith.extui %2 : i1 to i32
    %c0_i32_1 = arith.constant 0 : i32
    %4 = arith.cmpi ne, %3, %c0_i32_1 : i32
    scf.if %4 {
      %cst_13 = arith.constant 0.000000e+00 : f32
      %16 = vector.broadcast %cst_13 : f32 to vector<32x1xf32>
      %c0_14 = arith.constant 0 : index
      %c0_15 = arith.constant 0 : index
      %17 = vector.load %arg3[%c0_14, %c0_15] : memref<32x1xf32, #tpu.memory_space<vmem>>, vector<32x1xf32>
      tpu.vector_store %arg3[%c0_14, %c0_15], %16 {strides = array<i32>} : memref<32x1xf32, #tpu.memory_space<vmem>>, vector<32x1xf32>,
      %cst_16 = arith.constant 0.000000e+00 : f32
      %18 = vector.broadcast %cst_16 : f32 to vector<32x32xf32>
      %c0_17 = arith.constant 0 : index
      %c0_18 = arith.constant 0 : index
      %19 = vector.load %arg4[%c0_17, %c0_18] : memref<32x32xf32, #tpu.memory_space<vmem>>, vector<32x32xf32>
      tpu.vector_store %arg4[%c0_17, %c0_18], %18 {strides = array<i32>} : memref<32x32xf32, #tpu.memory_space<vmem>>, vector<32x32xf32>,
    } else {
    }
    %c0 = arith.constant 0 : index
    %c0_2 = arith.constant 0 : index
    %c0_3 = arith.constant 0 : index
    %5 = vector.load %arg2[%c0, %c0_2, %c0_3] : memref<1x32x256xf32, #tpu.memory_space<vmem>>, vector<1x32x256xf32>
    %6 = vector.shape_cast %5 : vector<1x32x256xf32> to vector<32x256xf32>
    %c0_4 = arith.constant 0 : index
    %c0_5 = arith.constant 0 : index
    %7 = vector.load %arg3[%c0_4, %c0_5] : memref<32x1xf32, #tpu.memory_space<vmem>>, vector<32x1xf32>
    %cst = arith.constant dense<0.000000e+00> : vector<32xf32>
    %8 = vector.multi_reduction <add>, %6, %cst [1] : vector<32x256xf32> to vector<32xf32>
    %9 = vector.shape_cast %8 : vector<32xf32> to vector<32x1xf32>
    %10 = arith.addf %7, %9 : vector<32x1xf32>
    %c0_6 = arith.constant 0 : index
    %c0_7 = arith.constant 0 : index
    %11 = vector.load %arg3[%c0_6, %c0_7] : memref<32x1xf32, #tpu.memory_space<vmem>>, vector<32x1xf32>
    tpu.vector_store %arg3[%c0_6, %c0_7], %10 {strides = array<i32>} : memref<32x1xf32, #tpu.memory_space<vmem>>, vector<32x1xf32>,
    %c0_8 = arith.constant 0 : index
    %c0_9 = arith.constant 0 : index
    %12 = vector.load %arg4[%c0_8, %c0_9] : memref<32x32xf32, #tpu.memory_space<vmem>>, vector<32x32xf32>
    %cst_10 = arith.constant dense<0.000000e+00> : vector<32x32xf32>
    %13 = tpu.matmul %6, %6, %cst_10 {dimension_numbers = #tpu.dot_dimension_numbers<[1], [1], [0], [0], [0, 0, 1, 0], [], []>} : vector<32x256xf32>, vector<32x256xf32>, vector<32x32xf32> -> vector<32x32xf32>
    %14 = arith.addf %12, %13 : vector<32x32xf32>
    %c0_11 = arith.constant 0 : index
    %c0_12 = arith.constant 0 : index
    %15 = vector.load %arg4[%c0_11, %c0_12] : memref<32x32xf32, #tpu.memory_space<vmem>>, vector<32x32xf32>
    tpu.vector_store %arg4[%c0_11, %c0_12], %14 {strides = array<i32>} : memref<32x32xf32, #tpu.memory_space<vmem>>, vector<32x32xf32>,
    return
  }
  func.func @transform_0(%arg0: i32, %arg1: i32) -> (i32, i32, i32) {
    %c0_i32 = arith.constant 0 : i32
    %c0_i32_0 = arith.constant 0 : i32
    return %arg0, %c0_i32, %arg1 : i32, i32, i32
  }
  func.func @transform_1(%arg0: i32, %arg1: i32) -> (i32, i32) {
    %c0_i32 = arith.constant 0 : i32
    %c0_i32_0 = arith.constant 0 : i32
    %c0_i32_1 = arith.constant 0 : i32
    return %c0_i32, %c0_i32_0 : i32, i32
  }
  func.func @transform_2(%arg0: i32, %arg1: i32) -> (i32, i32) {
    %c0_i32 = arith.constant 0 : i32
    %c0_i32_0 = arith.constant 0 : i32
    %c0_i32_1 = arith.constant 0 : i32
    return %c0_i32, %c0_i32_0 : i32, i32
  }
}

module attributes {stable_mosaic.version = 11 : i64} {
  func.func @_apply_kernel(%arg0: i32, %arg1: i32, %arg2: memref<1x32x256xf32, #tpu.memory_space<vmem>>, %arg3: memref<32x1xf32, #tpu.memory_space<vmem>>, %arg4: memref<1x1xf32, #tpu.memory_space<vmem>>, %arg5: memref<1x1x256xf32, #tpu.memory_space<vmem>>) attributes {dimension_semantics = [#tpu.dimension_semantics<parallel>, #tpu.dimension_semantics<parallel>], iteration_bounds = array<i64: 2, 1>, scalar_prefetch = 0 : i64, scratch_operands = 0 : i64, tpu.core_type = #tpu.core_type<tc>, window_params = [{transform_indices = @transform_0, window_bounds = array<i64: 1, 32, 256>}, {pipeline_mode = #tpu.pipeline_mode<synchronous>, transform_indices = @transform_1, window_bounds = array<i64: 32, 1>}, {pipeline_mode = #tpu.pipeline_mode<synchronous>, transform_indices = @transform_2, window_bounds = array<i64: 1, 1>}, {transform_indices = @transform_3, window_bounds = array<i64: 1, 1, 256>}]} {
    %c0 = arith.constant 0 : index
    %c0_0 = arith.constant 0 : index
    %c0_1 = arith.constant 0 : index
    %0 = vector.load %arg2[%c0, %c0_0, %c0_1] : memref<1x32x256xf32, #tpu.memory_space<vmem>>, vector<1x32x256xf32>
    %1 = vector.shape_cast %0 : vector<1x32x256xf32> to vector<32x256xf32>
    %c0_2 = arith.constant 0 : index
    %c0_3 = arith.constant 0 : index
    %2 = vector.load %arg3[%c0_2, %c0_3] : memref<32x1xf32, #tpu.memory_space<vmem>>, vector<32x1xf32>
    %3 = vector.broadcast %2 : vector<32x1xf32> to vector<32x256xf32>
    %4 = arith.mulf %1, %3 : vector<32x256xf32>
    %cst = arith.constant dense<0.000000e+00> : vector<256xf32>
    %5 = vector.multi_reduction <add>, %4, %cst [0] : vector<32x256xf32> to vector<256xf32>
    %6 = vector.shape_cast %5 : vector<256xf32> to vector<1x256xf32>
    %c0_4 = arith.constant 0 : index
    %c0_5 = arith.constant 0 : index
    %7 = vector.load %arg4[%c0_4, %c0_5] : memref<1x1xf32, #tpu.memory_space<vmem>>, vector<1x1xf32>
    %8 = vector.broadcast %7 : vector<1x1xf32> to vector<1x256xf32>
    %9 = arith.addf %6, %8 : vector<1x256xf32>
    %10 = arith.negf %9 : vector<1x256xf32>
    %11 = math.exp %10 : vector<1x256xf32>
    %cst_6 = arith.constant 1.000000e+00 : f32
    %12 = vector.broadcast %cst_6 : f32 to vector<1x256xf32>
    %13 = arith.addf %12, %11 : vector<1x256xf32>
    %14 = arith.divf %12, %13 : vector<1x256xf32>
    %c0_7 = arith.constant 0 : index
    %c0_8 = arith.constant 0 : index
    %c0_9 = arith.constant 0 : index
    %15 = vector.load %arg5[%c0_7, %c0_8, %c0_9] : memref<1x1x256xf32, #tpu.memory_space<vmem>>, vector<1x1x256xf32>
    %16 = vector.shape_cast %15 : vector<1x1x256xf32> to vector<1x256xf32>
    %17 = vector.shape_cast %14 : vector<1x256xf32> to vector<1x1x256xf32>
    tpu.vector_store %arg5[%c0_7, %c0_8, %c0_9], %17 {strides = array<i32>} : memref<1x1x256xf32, #tpu.memory_space<vmem>>, vector<1x1x256xf32>,
    return
  }
  func.func @transform_0(%arg0: i32, %arg1: i32) -> (i32, i32, i32) {
    %c0_i32 = arith.constant 0 : i32
    %c0_i32_0 = arith.constant 0 : i32
    return %arg0, %c0_i32, %arg1 : i32, i32, i32
  }
  func.func @transform_1(%arg0: i32, %arg1: i32) -> (i32, i32) {
    %c0_i32 = arith.constant 0 : i32
    %c0_i32_0 = arith.constant 0 : i32
    %c0_i32_1 = arith.constant 0 : i32
    return %c0_i32, %c0_i32_0 : i32, i32
  }
  func.func @transform_2(%arg0: i32, %arg1: i32) -> (i32, i32) {
    %c0_i32 = arith.constant 0 : i32
    %c0_i32_0 = arith.constant 0 : i32
    %c0_i32_1 = arith.constant 0 : i32
    return %c0_i32, %c0_i32_0 : i32, i32
  }
  func.func @transform_3(%arg0: i32, %arg1: i32) -> (i32, i32, i32) {
    %c0_i32 = arith.constant 0 : i32
    %c0_i32_0 = arith.constant 0 : i32
    return %arg0, %c0_i32, %arg1 : i32, i32, i32
  }
}

</mosaic_0001>

<bundles_post_ra>
// kernel: detection_header.2
= control target key start
LH: loop header
LB: loop body
LE: loop exit
PB: predicated region body
PF: predicated region fallthrough
CT: control target
= control target key end

     0   :  { %s407_s9 = smov 0   ;;  %s409_s10 = smov 0   ;;  %s513_s0 = inlined_call_operand.vmem [shape: f32[2,32,256], index: 0, kind: input, shape index: {}]   ;;  %s514_s1 = inlined_call_operand.vmem [shape: f32[32,1], index: 1, kind: output, shape index: {0}]   ;;  %s515_s2 = inlined_call_operand.vmem [shape: f32[32,32], index: 2, kind: output, shape index: {1}]  }
   0x1   :  { %s411_s11 = smov 0  }
   0x2 LB: > { %s25_s12 = sadd.s32 1, %s385_s10  ;;  %p326_p0 = scmp.ge.s32.totalorder %s389_s11, 1  ;;  %s389_s11 = sphi %s411_s11, %s13_s11   ;;  %s385_s10 = sphi %s409_s10, %s517_s10   ;;  %s381_s9 = sphi %s407_s9, %s516_s9  }
   0x3   : > { %p27_p1 = scmp.ge.s32.totalorder %s25_s12, 2  ;;  %p124_p2 = scmp.lt.s32.totalorder %s389_s11, 3 }
   0x5   : > { %s519_s12 = smov (%p27_p1, %s25_s12), 0  ;;  %p125_p3 = pnand %p326_p0, %p124_p2 }
   0x6   : > { %p146_p4 = scmp.lt.s32.totalorder (!%p125_p3), %s381_s9, 1  ;;  %p155_p5 = scmp.eq.s32.totalorder (!%p125_p3), %s381_s9, 0 }
   0x7   : > { %128 = sbr.rel (%p125_p3) target bundleno = 182 (0xb6), region = 24 }
   0xc   : > { %s521_s9 = smov (!%p146_p4, %s381_s9), 1  ;;  %160 = sbr.rel (!%p155_p5) target bundleno = 21 (0x15), region = 28  ;;  %vm161_vm0 = vcmask (%p155_p5), 7168   ;;  %v391_v0 = vmov (%p155_p5), 0.0   ;;  %vm166_vm1 = vcmask (%p155_p5), 261120  }
   0xd   : > { %s332_s13 = sshll.u32 %s521_s9, 6  ;;  %162 = vst.msk [vmem:[%s514_s1] sm:$0xff] (%p155_p5), %vm161_vm0, %v391_v0 }
   0xe   : > { %s153_s16 = scalar_lea.vmem %s513_s0, %s332_s13  ;;  %163 = vst.msk [vmem:[%s514_s1 + $0x8] sm:$0xff] (%p155_p5), %vm161_vm0, %v391_v0 }
   0xf   : > { %164 = vst.msk [vmem:[%s514_s1 + $0x10] sm:$0xff] (%p155_p5), %vm161_vm0, %v391_v0 }
  0x10   : > { %165 = vst.msk [vmem:[%s514_s1 + $0x18] sm:$0xff] (%p155_p5), %vm161_vm0, %v391_v0 }
  0x11   : > { %167 = vst.msk [vmem:[%s515_s2] sm:$0xff] %vm166_vm1, %v391_v0 }
  0x12   : > { %168 = vst.msk [vmem:[%s515_s2 + $0x8] sm:$0xff] %vm166_vm1, %v391_v0 }
  0x13   : > { %169 = vst.msk [vmem:[%s515_s2 + $0x10] sm:$0xff] %vm166_vm1, %v391_v0 }
  0x14   : > { %170 = vst.msk [vmem:[%s515_s2 + $0x18] sm:$0xff] %vm166_vm1, %v391_v0 }
  0x15 PF: > { %v177_v1 = vld [vmem:[%s153_s16 + $0x30] sm:$0xff]  ;;  %v178_v2 = vld [vmem:[%s153_s16 + $0x38] sm:$0xff]  ;;  %v175_v3 = vld [vmem:[%s153_s16 + $0x20] sm:$0xff]  ;;  %vm199_vm2 = vcmask 7168   ;;  %vm270_vm3 = vcmask 261120  }
  0x16   : > { %334 = vmatpush.xpose.msra.mxu2 %v177_v1  ;;  %338 = vmatpush.xpose.msra.mxu3 %v178_v2  ;;  %v176_v4 = vld [vmem:[%s153_s16 + $0x28] sm:$0xff]  ;;  %v171_v5 = vld [vmem:[%s153_s16] sm:$0xff]  ;;  %v173_v9 = vld [vmem:[%s153_s16 + $0x10] sm:$0xff]  ;;  %v192_v11 = vadd.f32 %v178_v2, %v177_v1 }
  0x17   : > { %220 = vmatpush.xpose.msra.mxu0 %v177_v1  ;;  %249 = vmatpush.xpose.msra.mxu1 %v178_v2  ;;  %v172_v6 = vld [vmem:[%s153_s16 + $0x8] sm:$0xff]  ;;  %v189_v7 = vadd.f32 %v176_v4, %v175_v3  ;;  %v174_v10 = vld [vmem:[%s153_s16 + $0x18] sm:$0xff] }
  0x18   : > { %v183_v8 = vadd.f32 %v172_v6, %v171_v5  ;;  %v186_v12 = vadd.f32 %v174_v10, %v173_v9  ;;  %v179_v16 = vld [vmem:[%s514_s1] sm:$0xff] }
  0x19   : > { %190 = vadd.xlane.f32.xlu1 %v189_v7  ;;  %v180_v22 = vld [vmem:[%s514_s1 + $0x8] sm:$0xff] }
  0x1a   : > { %335 = vmatpush.xpose.msra.mxu2 %v175_v3  ;;  %339 = vmatpush.xpose.msra.mxu3 %v176_v4  ;;  %v181_v13 = vld [vmem:[%s514_s1 + $0x10] sm:$0xff]  ;;  %v205_v36 = vld [vmem:[%s515_s2 + $0x8] sm:$0xff] }
  0x1b   : > { %221 = vmatpush.xpose.msra.mxu0 %v175_v3  ;;  %250 = vmatpush.xpose.msra.mxu1 %v176_v4  ;;  %v182_v19 = vld [vmem:[%s514_s1 + $0x18] sm:$0xff]  ;;  %v206_v31 = vld [vmem:[%s515_s2 + $0x10] sm:$0xff] }
  0x1c   : > { %184 = vadd.xlane.f32.xlu0 %v183_v8  ;;  %v204_v26 = vld [vmem:[%s515_s2] sm:$0xff]  ;;  %v207_v41 = vld [vmem:[%s515_s2 + $0x18] sm:$0xff] }
  0x1e   : > { %336 = vmatpush.xpose.msra.mxu2 %v173_v9  ;;  %340 = vmatpush.xpose.msra.mxu3 %v174_v10 }
  0x1f   : > { %222 = vmatpush.xpose.msra.mxu0 %v173_v9  ;;  %251 = vmatpush.xpose.msra.mxu1 %v174_v10 }
  0x21   : > { %193 = vadd.xlane.f32.xlu1 %v192_v11 }
  0x22   : > { %337 = vmatpush.xpose.msra.mxu2 %v171_v5  ;;  %341 = vmatpush.xpose.msra.mxu3 %v172_v6 }
  0x23   : > { %223 = vmatpush.xpose.msra.mxu0 %v171_v5  ;;  %252 = vmatpush.xpose.msra.mxu1 %v172_v6 }
  0x24   : > { %187 = vadd.xlane.f32.xlu0 %v186_v12 }
  0x25   : > { %230 = vmatmul.f32.vlgmr.msra.gmra.mxu2 %v175_v3  ;;  %259 = vmatmul.f32.vlgmr.msra.gmra.mxu3 %v176_v4 }
  0x26   : > { %224 = vmatmul.f32.vlgmr.msra.gmra.mxu0 %v171_v5  ;;  %253 = vmatmul.f32.vlgmr.msra.gmra.mxu1 %v172_v6 }
  0x2d   : > { %233 = vmatmul.f32.gmra.mxu2 %v177_v1  ;;  %262 = vmatmul.f32.gmra.mxu3 %v178_v2 }
  0x2e   : > { %227 = vmatmul.f32.gmra.mxu0 %v173_v9  ;;  %256 = vmatmul.f32.gmra.mxu1 %v174_v10 }
  0x8c   : > { %v191_v14 = vpop.xlane.xlu1 %190 }
  0x8d   : > { %v197_v15 = vadd.f32 %v191_v14, %v181_v13 }
  0x8f   : > { %202 = vst.msk [vmem:[%s514_s1 + $0x10] sm:$0xff] %vm199_vm2, %v197_v15  ;;  %v185_v17 = vpop.xlane.xlu0 %184 }
  0x90   : > { %v195_v18 = vadd.f32 %v185_v17, %v179_v16 }
  0x92   : > { %200 = vst.msk [vmem:[%s514_s1] sm:$0xff] %vm199_vm2, %v195_v18 }
  0x94   : > { %v194_v20 = vpop.xlane.xlu1 %193 }
  0x95   : > { %v198_v21 = vadd.f32 %v194_v20, %v182_v19 }
  0x97   : > { %203 = vst.msk [vmem:[%s514_s1 + $0x18] sm:$0xff] %vm199_vm2, %v198_v21  ;;  %v188_v23 = vpop.xlane.xlu0 %187 }
  0x98   : > { %v196_v24 = vadd.f32 %v188_v23, %v180_v22 }
  0x9a   : > { %201 = vst.msk [vmem:[%s514_s1 + $0x8] sm:$0xff] %vm199_vm2, %v196_v24 }
  0xa3   : > { %v225_v25 = vpop.f32.mrf.mxu0  ;;  %v254_v27 = vpop.f32.mrf.mxu1 }
  0xa4   : > { %v255_v28 = vadd.f32 %v254_v27, %v225_v25 }
  0xa6   : > { %v266_v29 = vadd.f32 %v255_v28, %v204_v26 }
  0xa8   : > { %v231_v30 = vpop.f32.mrf.mxu2  ;;  %271 = vst.msk [vmem:[%s515_s2] sm:$0xff] %vm270_vm3, %v266_v29  ;;  %v260_v32 = vpop.f32.mrf.mxu3 }
  0xa9   : > { %v261_v33 = vadd.f32 %v260_v32, %v231_v30 }
  0xab   : > { %v268_v34 = vadd.f32 %v261_v33, %v206_v31  ;;  %v228_v35 = vpop.f32.mrf.mxu0  ;;  %v257_v37 = vpop.f32.mrf.mxu1 }
  0xac   : > { %v258_v38 = vadd.f32 %v257_v37, %v228_v35 }
  0xad   : > { %273 = vst.msk [vmem:[%s515_s2 + $0x10] sm:$0xff] %vm270_vm3, %v268_v34 }
  0xae   : > { %v267_v39 = vadd.f32 %v258_v38, %v205_v36 }
  0xb0   : > { %v234_v40 = vpop.f32.mrf.mxu2  ;;  %272 = vst.msk [vmem:[%s515_s2 + $0x8] sm:$0xff] %vm270_vm3, %v267_v39  ;;  %v263_v42 = vpop.f32.mrf.mxu3 }
  0xb1   : > { %v264_v43 = vadd.f32 %v263_v42, %v234_v40 }
  0xb3   : > { %v269_v44 = vadd.f32 %v264_v43, %v207_v41 }
  0xb5   : > { %274 = vst.msk [vmem:[%s515_s2 + $0x18] sm:$0xff] %vm270_vm3, %v269_v44 }
  0xb6 PF: > { %s13_s11 = sadd.s32 1, %s389_s11   ;;  %s516_s9 = smov %s385_s10 }
  0xb7   : > { %p10_p6 = scmp.ge.s32.totalorder %s13_s11, 4   ;;  %s517_s10 = smov %s519_s12 }
  0xb9   :  { %12 = sbr.rel (!%p10_p6) target bundleno = 2 (0x2), region = 62 }

// kernel: detection_header.3
= control target key start
LH: loop header
LB: loop body
LE: loop exit
PB: predicated region body
PF: predicated region fallthrough
CT: control target
= control target key end

     0   :  { %s504_s14 = smov 0   ;;  %s506_s15 = smov 0   ;;  %s559_s0 = inlined_call_operand.vmem [shape: f32[2,32,256], index: 0, kind: input, shape index: {}]   ;;  %s560_s1 = inlined_call_operand.vmem [shape: f32[32,1], index: 1, kind: input, shape index: {}]   ;;  %s561_s2 = inlined_call_operand.<no memory space> [shape: f32[1,1], index: 2, kind: input, shape index: {}]   ;;  %s562_s3 = inlined_call_operand.vmem [shape: f32[2,1,256], index: 3, kind: output, shape index: {}]  }
   0x1   :  { %v8_v0 = vstv %s561_s2  ;;  %s508_s16 = smov 0  }
   0x2   :  { %9 = vst [vmem:[#allocation2] sm:$0x1] %v8_v0 }
   0x3 LB: > { %s27_s2 = sadd.s32 1, %s474_s15  ;;  %p411_p0 = scmp.ge.s32.totalorder %s478_s16, 1  ;;  %s478_s16 = sphi %s508_s16, %s15_s16   ;;  %s474_s15 = sphi %s506_s15, %s566_s15   ;;  %s470_s14 = sphi %s504_s14, %s565_s14  }
   0x4   : > { %p29_p1 = scmp.ge.s32.totalorder %s27_s2, 2  ;;  %p160_p2 = scmp.lt.s32.totalorder %s478_s16, 3 }
   0x6   : > { %s568_s2 = smov (%p29_p1, %s27_s2), 0  ;;  %p161_p3 = pnand %p411_p0, %p160_p2 }
   0x7   : > { %p192_p4 = scmp.lt.s32.totalorder (!%p161_p3), %s470_s14, 1 }
   0x8   : > { %164 = sbr.rel (%p161_p3) target bundleno = 193 (0xc1), region = 32 }
   0xd   : > { %v220_v1 = vld [vmem:[%s560_s1 + $0x10] sm:$0xff]  ;;  %v218_v2 = vld [vmem:[%s560_s1] sm:$0xff]  ;;  %v480_v3 = vmov 0   ;;  %v221_v5 = vld [vmem:[%s560_s1 + $0x18] sm:$0xff]  ;;  %s570_s14 = smov (!%p192_p4, %s470_s14), 1  ;;  %vm318_vm7 = vcmask 1040384  }
   0xe   : > { %446 = vset.pattern.permute.xlu1 %v480_v3  ;;  %445 = vset.pattern.permute.xlu0 %v480_v3  ;;  %v268_v4 = vld [vmem:[#allocation2] sm:$0x1]  ;;  %v219_v6 = vld [vmem:[%s560_s1 + $0x8] sm:$0xff]  ;;  %s419_s25 = sshll.u32 %s570_s14, 6  ;;  %s414_s29 = sshll.u32 %s570_s14, 1 }
   0xf   : > { %234 = vperm.xlu1 %446, %v220_v1   ;;  %224 = vperm.xlu0 %445, %v218_v2   ;;  %s199_s28 = scalar_lea.vmem %s559_s0, %s419_s25  ;;  %s208_s5 = scalar_lea.vmem %s562_s3, %s414_s29 }
  0x10   : > { %447 = vset.pattern.permute.xlu2 %v480_v3  ;;  %v210_v9 = vld [vmem:[%s199_s28] sm:$0xff]  ;;  %v211_v10 = vld [vmem:[%s199_s28 + $0x8] sm:$0xff]  ;;  %v212_v11 = vld [vmem:[%s199_s28 + $0x10] sm:$0xff]  ;;  %v321_v3 = vlaneseq }
  0x11   : > { %271 = vperm.xlu2 %447, %v268_v4   ;;  %v213_v12 = vld [vmem:[%s199_s28 + $0x18] sm:$0xff]  ;;  %v214_v13 = vld [vmem:[%s199_s28 + $0x20] sm:$0xff]  ;;  %v215_v14 = vld [vmem:[%s199_s28 + $0x28] sm:$0xff] }
  0x12   : > { %v216_v21 = vld [vmem:[%s199_s28 + $0x30] sm:$0xff]  ;;  %v217_v22 = vld [vmem:[%s199_s28 + $0x38] sm:$0xff]  ;;  %vm323_vm8 = vcmp.lt.s32.totalorder %v321_v3, 256 }
  0x17   : > { %239 = vperm.xlu1 %446, %v221_v5   ;;  %229 = vperm.xlu0 %445, %v219_v6  }
  0x6b   : > { %v272_v39 = vpop.permute.xlu2 %271 }
  0x6c   : > { %v274_v44 = vperm.slane %v272_v39, 0 }
  0x81   : > { %v235_v7 = vpop.permute.xlu1 %234  ;;  %v225_v8 = vpop.permute.xlu0 %224 }
  0x82   : > { %v242_v16 = vmul.f32 %v225_v8, %v210_v9  ;;  %v243_v17 = vmul.f32 %v225_v8, %v211_v10  ;;  %v246_v23 = vmul.f32 %v235_v7, %v214_v13  ;;  %v247_v24 = vmul.f32 %v235_v7, %v215_v14 }
  0x89   : > { %v230_v15 = vpop.permute.xlu0 %229  ;;  %v240_v20 = vpop.permute.xlu1 %239 }
  0x8a   : > { %v244_v18 = vmul.f32 %v230_v15, %v212_v11  ;;  %v245_v19 = vmul.f32 %v230_v15, %v213_v12  ;;  %v248_v27 = vmul.f32 %v240_v20, %v216_v21  ;;  %v249_v28 = vmul.f32 %v240_v20, %v217_v22 }
  0x8c   : > { %v250_v25 = vadd.f32 %v244_v18, %v242_v16  ;;  %v259_v26 = vadd.f32 %v245_v19, %v243_v17 }
  0x8e   : > { %v251_v29 = vadd.f32 %v250_v25, %v246_v23  ;;  %v260_v30 = vadd.f32 %v259_v26, %v247_v24 }
  0x90   : > { %v252_v31 = vadd.f32 %v251_v29, %v248_v27  ;;  %v261_v32 = vadd.f32 %v260_v30, %v249_v28 }
  0x92   : > { %v253_v33 = vrot.slane %v252_v31, 4  ;;  %v262_v34 = vrot.slane %v261_v32, 4 }
  0x94   : > { %v254_v35 = vadd.f32 %v253_v33, %v252_v31  ;;  %v263_v36 = vadd.f32 %v262_v34, %v261_v32 }
  0x96   : > { %v255_v37 = vrot.slane %v254_v35, 2  ;;  %v264_v38 = vrot.slane %v263_v36, 2 }
  0x98   : > { %v256_v40 = vadd.f32 %v255_v37, %v254_v35  ;;  %v265_v41 = vadd.f32 %v264_v38, %v263_v36 }
  0x9a   : > { %v257_v42 = vrot.slane %v256_v40, 1  ;;  %v266_v43 = vrot.slane %v265_v41, 1 }
  0x9c   : > { %v258_v45 = vadd.f32 %v257_v42, %v256_v40  ;;  %v267_v46 = vadd.f32 %v266_v43, %v265_v41 }
  0x9e   : > { %v275_v47 = vadd.f32 %v274_v44, %v258_v45  ;;  %v276_v48 = vadd.f32 %v274_v44, %v267_v46 }
  0xa0   : > { %v415_v49 = vmul.f32 -1.442695, %v275_v47  ;;  %v416_v50 = vmul.f32 -1.442695, %v276_v48 }
  0xa2   : > { %448 = vpow2.f32 %v415_v49 }
  0xa3   : > { %450 = vpow2.f32 %v416_v50 }
  0xa8   : > { %v449_v51 = vpop.eup %448 }
  0xa9   : > { %v451_v52 = vpop.eup %450  ;;  %v283_v53 = vadd.f32 1.0, %v449_v51 }
  0xaa   : > { %v284_v54 = vadd.f32 1.0, %v451_v52 }
  0xab   : > { %452 = vrcp.f32 %v283_v53  ;;  %vm290_vm2 = vweird.f32 %v283_v53  ;;  %v296_v2 = vand.u32 2147483648, %v283_v53  ;;  %v294_v5 = vand.u32 2147483647, %v283_v53 }
  0xac   : > { %454 = vrcp.f32 %v284_v54  ;;  %v311_v62 = vand.u32 2147483648, %v284_v54  ;;  %v309_v0 = vand.u32 2147483647, %v284_v54  ;;  %vm305_vm4 = vweird.f32 %v284_v54 }
  0xad   : > { %v297_v10 = vor.u32 1.1754944e-38, %v296_v2  ;;  %vm295_vm9 = vcmp.eq.f32.partialorder %v294_v5, 8.507059e+37 }
  0xae   : > { %v312_v7 = vor.u32 1.1754944e-38, %v311_v62  ;;  %vm310_vm6 = vcmp.eq.f32.partialorder %v309_v0, 8.507059e+37 }
  0xb1   : > { %v453_v55 = vpop.eup %452 }
  0xb2   : > { %v455_v56 = vpop.eup %454  ;;  %v286_v57 = vmul.f32 %v453_v55, %v283_v53  ;;  %vm291_vm0 = vweird.f32 %v453_v55 }
  0xb3   : > { %v301_v58 = vmul.f32 %v455_v56, %v284_v54  ;;  %vm306_vm1 = vweird.f32 %v455_v56  ;;  %vm540_vm3 = vmor %vm290_vm2, %vm291_vm0 }
  0xb4   : > { %v287_v59 = vsub.f32 1.0, %v286_v57  ;;  %vm307_vm5 = vmor %vm305_vm4, %vm306_vm1 }
  0xb5   : > { %v302_v60 = vsub.f32 1.0, %v301_v58 }
  0xb6   : > { %v288_v61 = vmul.f32 %v453_v55, %v287_v59 }
  0xb7   : > { %v303_v63 = vmul.f32 %v455_v56, %v302_v60 }
  0xb8   : > { %v289_v1 = vadd.f32 %v453_v55, %v288_v61 }
  0xb9   : > { %v304_v6 = vadd.f32 %v455_v56, %v303_v63 }
  0xba   : > { %v293_v8 = vsel %vm540_vm3, %v453_v55, %v289_v1 }
  0xbb   : > { %v308_v9 = vsel %vm307_vm5, %v455_v56, %v304_v6  ;;  %v298_v13 = vsel %vm295_vm9, %v297_v10, %v293_v8 }
  0xbc   : > { %v313_v11 = vsel %vm310_vm6, %v312_v7, %v308_v9 }
  0xbd   : > { %v317_v12 = vrot.slane %v313_v11, 7 }
  0xbf   : > { %v319_v14 = vsel %vm318_vm7, %v298_v13, %v317_v12 }
  0xc0   : > { %325 = vst.msk [vmem:[%s208_s5] sm:$0x3] %vm323_vm8, %v319_v14 }
  0xc1 PF: > { %s15_s16 = sadd.s32 1, %s478_s16   ;;  %s565_s14 = smov %s474_s15 }
  0xc2   : > { %p12_p5 = scmp.ge.s32.totalorder %s15_s16, 4   ;;  %s566_s15 = smov %s568_s2 }
  0xc4   :  { %14 = sbr.rel (!%p12_p5) target bundleno = 3 (0x3), region = 62 }

</bundles_post_ra>
